<compile_context>
chip_gen: v7x
topology: tpu7x:2x2x1
jax: 0.10.0
libtpu: 0.0.40
codegen_flags: <defaults>
</compile_context>

<pallas_src>
import functools

import jax
import jax.numpy as jnp
from jax.experimental import pallas as pl
from jax.experimental.pallas import tpu as pltpu

LANES = 128  # vreg lane width


def _round_up(a: int, b: int) -> int:
    return (a + b - 1) // b * b


def mymodel_kernel(w_ref, b_ref, x_ref, y_ref, out_ref, psum_ref, *,
                   n_valid: int, block_rows: int):
    """Fused linear(1->1) + ReLU + per-block squared-error partial sum.

    w_ref:    (1, 1)            SMEM  (Linear weight)
    b_ref:    (1,)              SMEM  (Linear bias)
    x_ref:    (block_rows, 128) VMEM  lane-dense input tile
    y_ref:    (block_rows, 128) VMEM  lane-dense target tile
    out_ref:  (block_rows, 128) VMEM  relu(w*x + b)
    psum_ref: (8, 128)          VMEM  partial sums of (out - y)^2 (masked)
    """
    w = w_ref[0, 0]
    b = b_ref[0]

    # Linear(1,1) is an elementwise scale+shift (pure VPU, no MXU needed).
    x = x_ref[...]
    out = jnp.maximum(x * w + b, 0.0)
    out_ref[...] = out

    # Squared error, masking off the tail padding (only last block has any).
    diff = out - y_ref[...]
    sq = diff * diff

    i = pl.program_id(0)
    rows = jax.lax.broadcasted_iota(jnp.int32, sq.shape, 0)
    cols = jax.lax.broadcasted_iota(jnp.int32, sq.shape, 1)
    local_idx = rows * LANES + cols
    remaining = n_valid - i * (block_rows * LANES)
    sq = jnp.where(local_idx < remaining, sq, 0.0)

    # Partial reduce (block_rows,128) -> (8,128); final reduce + 1/N in JAX.
    psum_ref[...] = sq.reshape(block_rows // 8, 8, LANES).sum(axis=0)


@functools.partial(jax.jit, static_argnames=("row_block",))
def mymodel_forward(x, y, weight, bias, *, row_block: int = 512):
    """Returns (relu(linear(x)), mse_loss), matching MyModel.forward + .loss."""
    total = x.size  # N * 1 elements
    xf = x.reshape(-1).astype(jnp.float32)
    yf = y.reshape(-1).astype(jnp.float32)

    rows = -(-total // LANES)                       # ceil(total / 128)
    rb = min(row_block, _round_up(max(rows, 1), 8))  # tile rows (multiple of 8)
    rows_p = _round_up(rows, rb)                     # padded row count
    padded = rows_p * LANES

    xp = jnp.pad(xf, (0, padded - total)).reshape(rows_p, LANES)
    yp = jnp.pad(yf, (0, padded - total)).reshape(rows_p, LANES)
    num_blocks = rows_p // rb

    kernel = functools.partial(mymodel_kernel, n_valid=total, block_rows=rb)

    out_p, psums = pl.pallas_call(
        kernel,
        grid=(num_blocks,),
        in_specs=[
            pl.BlockSpec(memory_space=pltpu.MemorySpace.SMEM),   # weight (1,1)
            pl.BlockSpec(memory_space=pltpu.MemorySpace.SMEM),   # bias   (1,)
            pl.BlockSpec((rb, LANES), lambda i: (i, 0)),         # x tile
            pl.BlockSpec((rb, LANES), lambda i: (i, 0)),         # y tile
        ],
        out_specs=(
            pl.BlockSpec((rb, LANES), lambda i: (i, 0)),         # out tile
            pl.BlockSpec((8, LANES), lambda i: (i, 0)),          # partial sums
        ),
        out_shape=(
            jax.ShapeDtypeStruct((rows_p, LANES), jnp.float32),
            jax.ShapeDtypeStruct((num_blocks * 8, LANES), jnp.float32),
        ),
        compiler_params=pltpu.CompilerParams(
            dimension_semantics=("parallel",),
        ),
    )(weight, bias, xp, yp)

    out = out_p.reshape(-1)[:total].reshape(x.shape)
    loss = jnp.sum(psums) * (1.0 / total)  # static 1/N, no runtime divide
    return out, loss


def _reference(x, y, weight, bias):
    out = jnp.maximum(x @ weight.T + bias, 0.0)
    return out, jnp.mean((out - y) ** 2)


if __name__ == "__main__":
    key = jax.random.PRNGKey(0)

    # Deterministic parameter init (xavier_uniform bound for Linear(1,1) is
    # sqrt(3); pick a fixed in-range value; bias zero per init_weights).
    weight = jnp.array([[0.5]], dtype=jnp.float32)  # (out=1, in=1)
    bias = jnp.array([0.0], dtype=jnp.float32)      # (out=1,)

    # --- small batch (matches nn.Linear(1,1) usage) ---
    kx, ky, kx2, ky2 = jax.random.split(key, 4)
    N = 8
    x = jax.random.normal(kx, (N, 1), dtype=jnp.float32)
    y = jax.random.normal(ky, (N, 1), dtype=jnp.float32)

    out, loss = mymodel_forward(x, y, weight, bias)
    jax.block_until_ready((out, loss))

    ref_out, ref_loss = _reference(x, y, weight, bias)
    assert jnp.allclose(out, ref_out, atol=1e-6), "output mismatch (small)"
    assert jnp.allclose(loss, ref_loss, rtol=1e-5, atol=1e-6), "loss mismatch (small)"

    # --- larger batch: exercises the multi-block grid + tail masking ---
    N2 = 150_000
    x2 = jax.random.normal(kx2, (N2, 1), dtype=jnp.float32)
    y2 = jax.random.normal(ky2, (N2, 1), dtype=jnp.float32)

    out2, loss2 = mymodel_forward(x2, y2, weight, bias)
    jax.block_until_ready((out2, loss2))

    ref_out2, ref_loss2 = _reference(x2, y2, weight, bias)
    assert jnp.allclose(out2, ref_out2, atol=1e-6), "output mismatch (large)"
    assert jnp.allclose(loss2, ref_loss2, rtol=1e-4, atol=1e-6), "loss mismatch (large)"

    print("KERNEL_OK")
</pallas_src>

<mosaic_0001>
module attributes {stable_mosaic.version = 11 : i64} {
  func.func @mymodel_kernel(%arg0: i32, %arg1: memref<1x1xf32, #tpu.memory_space<smem>>, %arg2: memref<1xf32, #tpu.memory_space<smem>>, %arg3: memref<8x128xf32, #tpu.memory_space<vmem>>, %arg4: memref<8x128xf32, #tpu.memory_space<vmem>>, %arg5: memref<8x128xf32, #tpu.memory_space<vmem>>, %arg6: memref<8x128xf32, #tpu.memory_space<vmem>>) attributes {dimension_semantics = [#tpu.dimension_semantics<parallel>], iteration_bounds = array<i64: 1>, scalar_prefetch = 0 : i64, scratch_operands = 0 : i64, tpu.core_type = #tpu.core_type<tc>, window_params = [{transform_indices = @transform_0, window_bounds = array<i64: 1, 1>}, {transform_indices = @transform_1, window_bounds = array<i64: 1>}, {transform_indices = @transform_2, window_bounds = array<i64: 8, 128>}, {transform_indices = @transform_3, window_bounds = array<i64: 8, 128>}, {transform_indices = @transform_4, window_bounds = array<i64: 8, 128>}, {transform_indices = @transform_5, window_bounds = array<i64: 8, 128>}]} {
    %c0 = arith.constant 0 : index
    %c0_0 = arith.constant 0 : index
    %0 = memref.load %arg1[%c0, %c0_0] : memref<1x1xf32, #tpu.memory_space<smem>>
    %c0_1 = arith.constant 0 : index
    %1 = memref.load %arg2[%c0_1] : memref<1xf32, #tpu.memory_space<smem>>
    %c0_2 = arith.constant 0 : index
    %c0_3 = arith.constant 0 : index
    %2 = vector.load %arg3[%c0_2, %c0_3] : memref<8x128xf32, #tpu.memory_space<vmem>>, vector<8x128xf32>
    %3 = vector.broadcast %0 : f32 to vector<8x128xf32>
    %4 = arith.mulf %2, %3 : vector<8x128xf32>
    %5 = vector.broadcast %1 : f32 to vector<8x128xf32>
    %6 = arith.addf %4, %5 : vector<8x128xf32>
    %cst = arith.constant 0.000000e+00 : f32
    %7 = vector.broadcast %cst : f32 to vector<8x128xf32>
    %8 = arith.maximumf %6, %7 : vector<8x128xf32>
    %c0_4 = arith.constant 0 : index
    %c0_5 = arith.constant 0 : index
    %9 = vector.load %arg5[%c0_4, %c0_5] : memref<8x128xf32, #tpu.memory_space<vmem>>, vector<8x128xf32>
    tpu.vector_store %arg5[%c0_4, %c0_5], %8 {strides = array<i32>} : memref<8x128xf32, #tpu.memory_space<vmem>>, vector<8x128xf32>,
    %c0_6 = arith.constant 0 : index
    %c0_7 = arith.constant 0 : index
    %10 = vector.load %arg4[%c0_6, %c0_7] : memref<8x128xf32, #tpu.memory_space<vmem>>, vector<8x128xf32>
    %11 = arith.subf %8, %10 : vector<8x128xf32>
    %12 = arith.mulf %11, %11 : vector<8x128xf32>
    %13 = tpu.iota {dimensions = array<i32: 0>} : vector<8x128xi32>
    %14 = tpu.iota {dimensions = array<i32: 1>} : vector<8x128xi32>
    %c128_i32 = arith.constant 128 : i32
    %15 = vector.broadcast %c128_i32 : i32 to vector<8x128xi32>
    %16 = arith.muli %13, %15 : vector<8x128xi32>
    %17 = arith.addi %16, %14 : vector<8x128xi32>
    %c1024_i32 = arith.constant 1024 : i32
    %18 = arith.muli %arg0, %c1024_i32 : i32
    %c8_i32 = arith.constant 8 : i32
    %19 = arith.subi %c8_i32, %18 : i32
    %20 = vector.broadcast %19 : i32 to vector<8x128xi32>
    %21 = arith.cmpi slt, %17, %20 : vector<8x128xi32>
    %cst_8 = arith.constant 0.000000e+00 : f32
    %22 = vector.broadcast %cst_8 : f32 to vector<8x128xf32>
    %23 = arith.select %21, %12, %22 : vector<8x128xi1>, vector<8x128xf32>
    %24 = vector.shape_cast %23 : vector<8x128xf32> to vector<1x8x128xf32>
    %cst_9 = arith.constant dense<0.000000e+00> : vector<8x128xf32>
    %25 = vector.multi_reduction <add>, %24, %cst_9 [0] : vector<1x8x128xf32> to vector<8x128xf32>
    %c0_10 = arith.constant 0 : index
    %c0_11 = arith.constant 0 : index
    %26 = vector.load %arg6[%c0_10, %c0_11] : memref<8x128xf32, #tpu.memory_space<vmem>>, vector<8x128xf32>
    tpu.vector_store %arg6[%c0_10, %c0_11], %25 {strides = array<i32>} : memref<8x128xf32, #tpu.memory_space<vmem>>, vector<8x128xf32>,
    return
  }
  func.func @transform_0(%arg0: i32) -> (i32, i32) {
    %c0_i32 = arith.constant 0 : i32
    %c0_i32_0 = arith.constant 0 : i32
    %c0_i32_1 = arith.constant 0 : i32
    return %c0_i32, %c0_i32_0 : i32, i32
  }
  func.func @transform_1(%arg0: i32) -> i32 {
    %c0_i32 = arith.constant 0 : i32
    %c0_i32_0 = arith.constant 0 : i32
    return %c0_i32 : i32
  }
  func.func @transform_2(%arg0: i32) -> (i32, i32) {
    %c0_i32 = arith.constant 0 : i32
    %c0_i32_0 = arith.constant 0 : i32
    return %arg0, %c0_i32 : i32, i32
  }
  func.func @transform_3(%arg0: i32) -> (i32, i32) {
    %c0_i32 = arith.constant 0 : i32
    %c0_i32_0 = arith.constant 0 : i32
    return %arg0, %c0_i32 : i32, i32
  }
  func.func @transform_4(%arg0: i32) -> (i32, i32) {
    %c0_i32 = arith.constant 0 : i32
    %c0_i32_0 = arith.constant 0 : i32
    return %arg0, %c0_i32 : i32, i32
  }
  func.func @transform_5(%arg0: i32) -> (i32, i32) {
    %c0_i32 = arith.constant 0 : i32
    %c0_i32_0 = arith.constant 0 : i32
    return %arg0, %c0_i32 : i32, i32
  }
}

</mosaic_0001>

<bundles_post_ra>
// kernel: mymodel_forward.1
= control target key start
LH: loop header
LB: loop body
LE: loop exit
PB: predicated region body
PF: predicated region fallthrough
CT: control target
= control target key end

     0   :  { %v33_v0 = vlaneseq  ;;  %s102_s0 = inlined_call_operand.<no memory space> [shape: f32[1,1], index: 0, kind: input, shape index: {}]   ;;  %s103_s1 = inlined_call_operand.<no memory space> [shape: f32[1], index: 1, kind: input, shape index: {}]   ;;  %s104_s2 = inlined_call_operand.vmem [shape: f32[8,128], index: 2, kind: input, shape index: {}]   ;;  %s105_s3 = inlined_call_operand.vmem [shape: f32[8,128], index: 3, kind: input, shape index: {}]   ;;  %s106_s4 = inlined_call_operand.vmem [shape: f32[8,128], index: 4, kind: output, shape index: {0}]   ;;  %s107_s5 = inlined_call_operand.vmem [shape: f32[8,128], index: 5, kind: output, shape index: {1}]  }
   0x1   :  { %v23_v1 = vld [vmem:[%s104_s2] sm:$0xff]  ;;  %v24_v2 = vstv %s102_s0  ;;  %v26_v3 = vstv %s103_s1 }
   0x2   :  { %v25_v4 = vmul.f32 %v24_v2, %v23_v1  ;;  %v34_v5 = vshrl.u32 %v33_v0, 7  ;;  %v36_v6 = vand.u32 127, %v33_v0  ;;  %v30_v9 = vld [vmem:[%s105_s3] sm:$0xff] }
   0x4   :  { %v27_v7 = vadd.f32 %v26_v3, %v25_v4  ;;  %v37_v8 = vmul.u32 128, %v34_v5 }
   0x6   :  { %v28_v10 = vmax.f32 %v27_v7, 0.0  ;;  %v38_v11 = vadd.s32 %v37_v8, %v36_v6 }
   0x8   :  { %29 = vst [vmem:[%s106_s4] sm:$0xff] %v28_v10  ;;  %v31_v12 = vsub.f32 %v28_v10, %v30_v9  ;;  %vm42_vm0 = vcmp.lt.s32.totalorder %v38_v11, 8 }
   0xa   :  { %v32_v13 = vmul.f32 %v31_v12, %v31_v12 }
   0xc   :  { %v43_v14 = vsel %vm42_vm0, %v32_v13, 0.0 }
   0xd   :  { %45 = vst [vmem:[%s107_s5] sm:$0xff] %v43_v14 }

</bundles_post_ra>
